<compile_context>
chip_gen: v7x
topology: tpu7x:2x2x1
jax: 0.10.0
libtpu: 0.0.40
codegen_flags: <defaults>
</compile_context>

<pallas_src>
import jax
import jax.numpy as jnp
from jax.experimental import pallas as pl
from jax.experimental.pallas import tpu as pltpu


def _round_up(v, m):
    return ((v + m - 1) // m) * m


def _policy_kernel(xT_ref, w1_ref, w2_ref, w3_ref, outT_ref):
    # xT_ref: (num_inputs, tile_b) -- batch on the lane axis (lane-dense).
    xT = xT_ref[...]
    # Layer 1: tanh(W1 @ Xᵀ) -> (H, tile_b)
    h1 = jnp.tanh(jnp.dot(w1_ref[...], xT, preferred_element_type=jnp.float32))
    # Layer 2: tanh(W2 @ H1) -> (H, tile_b)
    h2 = jnp.tanh(jnp.dot(w2_ref[...], h1, preferred_element_type=jnp.float32))
    # Layer 3: logits = W3 @ H2 -> (A, tile_b)
    logits = jnp.dot(w3_ref[...], h2, preferred_element_type=jnp.float32)

    num_actions = logits.shape[0]  # static at trace time
    if num_actions == 2:
        # softmax over 2 classes == sigmoid of the logit difference (exact rewrite).
        d = logits[1:2, :] - logits[0:1, :]          # (1, tile_b)
        p1 = 1.0 / (1.0 + jnp.exp(-d))               # stable: exp(-d)->inf gives p1=0
        p0 = 1.0 - p1
        outT_ref[0:1, :] = p0.astype(outT_ref.dtype)
        outT_ref[1:2, :] = p1.astype(outT_ref.dtype)
    else:
        # General numerically-stable softmax over the action (sublane) axis.
        m = jnp.max(logits, axis=0, keepdims=True)
        e = jnp.exp(logits - m)
        denom = jnp.sum(e, axis=0, keepdims=True)
        outT_ref[...] = (e / denom).astype(outT_ref.dtype)


def two_layer_policy(x, w1, w2, w3, *, max_batch_tile=8192):
    """x: (B, num_inputs); w1: (H, num_inputs); w2: (H, H); w3: (A, H).
    Weights stay in PyTorch nn.Linear (out_features, in_features) layout.
    Returns softmax action probabilities of shape (B, A), float32."""
    B, num_inputs = x.shape
    H = w1.shape[0]
    A = w3.shape[0]

    # Present batch on the lane axis: (num_inputs, B) in, (A, B) out. The wrapper
    # transposes are tiny (num_inputs=4 / A=2 rows) and buy a fully lane-dense kernel.
    xT = x.T

    # Batch-tile selection:
    #  * B <= 1024: single tile (launch-overhead regime; splitting only adds steps).
    #  * 1024 < B <= max_batch_tile: two tiles (multiple of 128 lanes) so v7x's two
    #    TensorCores both get work under dimension_semantics=("parallel",).
    #  * B > max_batch_tile: 8192-row tiles; per-tile VMEM stays at a few MiB, well
    #    inside v7x's 64 MiB VMEM (and its 32 MiB default scoped limit).
    if B <= max_batch_tile:
        if B > 1024:
            tile_b = min(_round_up(pl.cdiv(B, 2), 128), max_batch_tile)
        else:
            tile_b = B
    else:
        tile_b = max_batch_tile
    grid = (pl.cdiv(B, tile_b),)

    flops = 2 * B * (num_inputs * H + H * H + H * A)
    transcendentals = B * (2 * H) + (B if A == 2 else B * A)  # tanh x2 + sigmoid/exp
    bytes_accessed = 4 * (x.size + w1.size + w2.size + w3.size + B * A)

    probsT = pl.pallas_call(
        _policy_kernel,
        out_shape=jax.ShapeDtypeStruct((A, B), jnp.float32),
        grid_spec=pltpu.PrefetchScalarGridSpec(
            num_scalar_prefetch=0,
            grid=grid,
            in_specs=[
                pl.BlockSpec((num_inputs, tile_b), lambda i: (0, i)),  # batch tile (lane-dense)
                pl.BlockSpec((H, num_inputs), lambda i: (0, 0)),       # resident weight
                pl.BlockSpec((H, H), lambda i: (0, 0)),                # resident weight
                pl.BlockSpec((A, H), lambda i: (0, 0)),                # resident weight
            ],
            out_specs=pl.BlockSpec((A, tile_b), lambda i: (0, i)),
        ),
        compiler_params=pltpu.CompilerParams(
            # Batch tiles are independent -> shard across v7x's 2 TensorCores;
            # harmless no-op on single-TC v5e/v6e.
            dimension_semantics=("parallel",),
        ),
        cost_estimate=pl.CostEstimate(
            flops=flops,
            transcendentals=transcendentals,
            bytes_accessed=bytes_accessed,
        ),
    )(xT, w1, w2, w3)

    return probsT.T


def _init_linear_weight(key, out_features, in_features):
    # Deterministic init mimicking nn.Linear default: U(-1/sqrt(fan_in), 1/sqrt(fan_in)).
    bound = 1.0 / jnp.sqrt(jnp.float32(in_features))
    return jax.random.uniform(
        key, (out_features, in_features), dtype=jnp.float32, minval=-bound, maxval=bound
    )


if __name__ == "__main__":
    # Small shapes implied by the module: batch=8, num_inputs=4, hidden=32, actions=2.
    batch = 8
    num_inputs = 4
    hidden_size = 32
    num_actions = 2

    key = jax.random.PRNGKey(0)
    kx, k1, k2, k3 = jax.random.split(key, 4)

    x = jax.random.normal(kx, (batch, num_inputs), dtype=jnp.float32)
    w1 = _init_linear_weight(k1, hidden_size, num_inputs)   # linear1.weight (out, in)
    w2 = _init_linear_weight(k2, hidden_size, hidden_size)  # linear2.weight (out, in)
    w3 = _init_linear_weight(k3, num_actions, hidden_size)  # linear3.weight (out, in)

    probs = two_layer_policy(x, w1, w2, w3)
    jax.block_until_ready(probs)

    # Reference check in plain JAX (same math path as the PyTorch module).
    h1 = jnp.tanh(x @ w1.T)
    h2 = jnp.tanh(h1 @ w2.T)
    logits = h2 @ w3.T
    ref = jax.nn.softmax(logits, axis=-1)
    assert probs.shape == (batch, num_actions)
    assert jnp.allclose(probs, ref, atol=1e-5, rtol=1e-5)
    assert jnp.allclose(jnp.sum(probs, axis=-1), 1.0, atol=1e-5)

    print("KERNEL_OK")
</pallas_src>

<mosaic_0001>
module attributes {stable_mosaic.version = 11 : i64} {
  func.func @_policy_kernel(%arg0: i32, %arg1: memref<4x8xf32, #tpu.memory_space<vmem>>, %arg2: memref<32x4xf32, #tpu.memory_space<vmem>>, %arg3: memref<32x32xf32, #tpu.memory_space<vmem>>, %arg4: memref<2x32xf32, #tpu.memory_space<vmem>>, %arg5: memref<2x8xf32, #tpu.memory_space<vmem>>) attributes {dimension_semantics = [#tpu.dimension_semantics<parallel>], iteration_bounds = array<i64: 1>, scalar_prefetch = 0 : i64, scratch_operands = 0 : i64, tpu.core_type = #tpu.core_type<tc>, window_params = [{transform_indices = @transform_0, window_bounds = array<i64: 4, 8>}, {pipeline_mode = #tpu.pipeline_mode<synchronous>, transform_indices = @transform_1, window_bounds = array<i64: 32, 4>}, {pipeline_mode = #tpu.pipeline_mode<synchronous>, transform_indices = @transform_2, window_bounds = array<i64: 32, 32>}, {pipeline_mode = #tpu.pipeline_mode<synchronous>, transform_indices = @transform_3, window_bounds = array<i64: 2, 32>}, {transform_indices = @transform_4, window_bounds = array<i64: 2, 8>}]} {
    %c0 = arith.constant 0 : index
    %c0_0 = arith.constant 0 : index
    %0 = vector.load %arg1[%c0, %c0_0] : memref<4x8xf32, #tpu.memory_space<vmem>>, vector<4x8xf32>
    %c0_1 = arith.constant 0 : index
    %c0_2 = arith.constant 0 : index
    %1 = vector.load %arg2[%c0_1, %c0_2] : memref<32x4xf32, #tpu.memory_space<vmem>>, vector<32x4xf32>
    %cst = arith.constant dense<0.000000e+00> : vector<32x8xf32>
    %2 = tpu.matmul %1, %0, %cst {dimension_numbers = #tpu.dot_dimension_numbers<[1], [0], [0], [1], [0, 0, 1, 1], [], []>} : vector<32x4xf32>, vector<4x8xf32>, vector<32x8xf32> -> vector<32x8xf32>
    %3 = math.tanh %2 : vector<32x8xf32>
    %c0_3 = arith.constant 0 : index
    %c0_4 = arith.constant 0 : index
    %4 = vector.load %arg3[%c0_3, %c0_4] : memref<32x32xf32, #tpu.memory_space<vmem>>, vector<32x32xf32>
    %cst_5 = arith.constant dense<0.000000e+00> : vector<32x8xf32>
    %5 = tpu.matmul %4, %3, %cst_5 {dimension_numbers = #tpu.dot_dimension_numbers<[1], [0], [0], [1], [0, 0, 1, 1], [], []>} : vector<32x32xf32>, vector<32x8xf32>, vector<32x8xf32> -> vector<32x8xf32>
    %6 = math.tanh %5 : vector<32x8xf32>
    %c0_6 = arith.constant 0 : index
    %c0_7 = arith.constant 0 : index
    %7 = vector.load %arg4[%c0_6, %c0_7] : memref<2x32xf32, #tpu.memory_space<vmem>>, vector<2x32xf32>
    %cst_8 = arith.constant dense<0.000000e+00> : vector<2x8xf32>
    %8 = tpu.matmul %7, %6, %cst_8 {dimension_numbers = #tpu.dot_dimension_numbers<[1], [0], [0], [1], [0, 0, 1, 1], [], []>} : vector<2x32xf32>, vector<32x8xf32>, vector<2x8xf32> -> vector<2x8xf32>
    %9 = vector.extract_strided_slice %8 {offsets = [1, 0], sizes = [1, 8], strides = [1, 1]} : vector<2x8xf32> to vector<1x8xf32>
    %10 = vector.extract_strided_slice %8 {offsets = [0, 0], sizes = [1, 8], strides = [1, 1]} : vector<2x8xf32> to vector<1x8xf32>
    %11 = arith.subf %9, %10 : vector<1x8xf32>
    %cst_9 = arith.constant 0.000000e+00 : f32
    %12 = vector.broadcast %cst_9 : f32 to vector<1x8xf32>
    %13 = arith.subf %12, %11 : vector<1x8xf32>
    %14 = math.exp %13 : vector<1x8xf32>
    %cst_10 = arith.constant 1.000000e+00 : f32
    %15 = vector.broadcast %cst_10 : f32 to vector<1x8xf32>
    %16 = arith.addf %15, %14 : vector<1x8xf32>
    %cst_11 = arith.constant 1.000000e+00 : f32
    %17 = vector.broadcast %cst_11 : f32 to vector<1x8xf32>
    %18 = arith.divf %17, %16 : vector<1x8xf32>
    %cst_12 = arith.constant 1.000000e+00 : f32
    %19 = vector.broadcast %cst_12 : f32 to vector<1x8xf32>
    %20 = arith.subf %19, %18 : vector<1x8xf32>
    %c0_13 = arith.constant 0 : index
    %c0_14 = arith.constant 0 : index
    %21 = vector.load %arg5[%c0_13, %c0_14] : memref<2x8xf32, #tpu.memory_space<vmem>>, vector<1x8xf32>
    tpu.vector_store %arg5[%c0_13, %c0_14], %20 {strides = array<i32>} : memref<2x8xf32, #tpu.memory_space<vmem>>, vector<1x8xf32>,
    %c1 = arith.constant 1 : index
    %c0_15 = arith.constant 0 : index
    %22 = vector.load %arg5[%c1, %c0_15] : memref<2x8xf32, #tpu.memory_space<vmem>>, vector<1x8xf32>
    tpu.vector_store %arg5[%c1, %c0_15], %18 {strides = array<i32>} : memref<2x8xf32, #tpu.memory_space<vmem>>, vector<1x8xf32>,
    return
  }
  func.func @transform_0(%arg0: i32) -> (i32, i32) {
    %c0_i32 = arith.constant 0 : i32
    %c0_i32_0 = arith.constant 0 : i32
    return %c0_i32, %arg0 : i32, i32
  }
  func.func @transform_1(%arg0: i32) -> (i32, i32) {
    %c0_i32 = arith.constant 0 : i32
    %c0_i32_0 = arith.constant 0 : i32
    %c0_i32_1 = arith.constant 0 : i32
    return %c0_i32, %c0_i32_0 : i32, i32
  }
  func.func @transform_2(%arg0: i32) -> (i32, i32) {
    %c0_i32 = arith.constant 0 : i32
    %c0_i32_0 = arith.constant 0 : i32
    %c0_i32_1 = arith.constant 0 : i32
    return %c0_i32, %c0_i32_0 : i32, i32
  }
  func.func @transform_3(%arg0: i32) -> (i32, i32) {
    %c0_i32 = arith.constant 0 : i32
    %c0_i32_0 = arith.constant 0 : i32
    %c0_i32_1 = arith.constant 0 : i32
    return %c0_i32, %c0_i32_0 : i32, i32
  }
  func.func @transform_4(%arg0: i32) -> (i32, i32) {
    %c0_i32 = arith.constant 0 : i32
    %c0_i32_0 = arith.constant 0 : i32
    return %c0_i32, %arg0 : i32, i32
  }
}

</mosaic_0001>

<bundles_post_ra>
// kernel: tpu_custom_call.1
= control target key start
LH: loop header
LB: loop body
LE: loop exit
PB: predicated region body
PF: predicated region fallthrough
CT: control target
= control target key end

     0   :  { %vm36_vm0 = vcmask 1043456   ;;  %vm23_vm1 = vcmask 31744   ;;  %s536_s0 = inlined_call_operand.vmem [shape: f32[4,8], index: 0, kind: input, shape index: {}]   ;;  %s537_s1 = inlined_call_operand.vmem [shape: f32[32,4], index: 1, kind: input, shape index: {}]   ;;  %s538_s2 = inlined_call_operand.vmem [shape: f32[32,32], index: 2, kind: input, shape index: {}]   ;;  %s539_s3 = inlined_call_operand.vmem [shape: f32[2,32], index: 3, kind: input, shape index: {}]   ;;  %s540_s4 = inlined_call_operand.hbm [shape: f32[2,8], index: 4, kind: output, shape index: {}]  }
   0x1   :  { %v18_v0 = vld [vmem:[%s536_s0] sm:$0xf]  ;;  %v20_v2 = vld [vmem:[%s537_s1 + $0x8] sm:$0xff]  ;;  %v21_v3 = vld [vmem:[%s537_s1 + $0x10] sm:$0xff] }
   0x2   :  { %v19_v1 = vld [vmem:[%s537_s1] sm:$0xff]  ;;  %365 = vmatprep.subr.msk.mxu0 %vm36_vm0, %v18_v0 }
   0x3   :  { %367 = vmatprep.mubr.msk.f32.mxu0 %vm23_vm1, %v19_v1 }
   0x4   :  { %9 = vsyncpa [#allocation3], 0  ;;  %366 = vmatpush3.msk.msra.mxu0 %vm36_vm0, %v18_v0  ;;  %v22_v4 = vld [vmem:[%s537_s1 + $0x18] sm:$0xff]  ;;  %v129_v5 = vld [vmem:[%s538_s2] sm:$0xff]  ;;  %vm133_vm2 = vcmask 261120   ;;  %v460_v19 = vmov 0.0|0.0  }
   0x5   :  { %368 = vmatmul.mubr.msk.f32.vlgmr.msra.gmra.mrb[0].mxu0 %vm23_vm1, %v20_v2  ;;  %381 = vmatprep.mubr.msk.f32.mxu1 %vm133_vm2, %v129_v5  ;;  %v130_v16 = vld [vmem:[%s538_s2 + $0x8] sm:$0xff]  ;;  %v131_v17 = vld [vmem:[%s538_s2 + $0x10] sm:$0xff]  ;;  %v132_v18 = vld [vmem:[%s538_s2 + $0x18] sm:$0xff]  ;;  %vm461_vm3 = vmmov 0   ;;  %v462_v20 = vmov 0.0   ;;  %vm320_vm4 = vcmask 58369  }
   0x6   :  { %370 = vmatprep.mubr.msk.f32.mxu0 %vm23_vm1, %v21_v3  ;;  %406 = vmatprep.subr.bf16.mxu0 %v460_v19  ;;  %v235_v31 = vld [vmem:[%s539_s3] sm:$0x3]  ;;  %s463_s6 = smov [#allocation2]  }
   0x7   :  { %s329_s7 = sshll.u32 %s463_s6, 4  ;;  %s330_s7 = int_to_ptr.vmem [resolvable:$true] %s329_s7 }
   0x8   :  { %s436_s3 = scalar_lea.vmem %s330_s7, 32  ;;  %p441_p1 = scmp.lt.s32.totalorder %s330_s7, %s330_s7 }
   0x9   :  { %371 = vmatmul.mubr.msk.f32.gmra.mrb[2].mxu0 %vm23_vm1, %v22_v4  ;;  %p437_p0 = scmp.ne.s32.totalorder %s330_s7, %s436_s3  ;;  %p442_p2 = scmp.lt.s32.totalorder %s436_s3, %s436_s3 }
   0xa   :  { %395 = vmatprep.mubr.msk.f32.mxu0 %vm461_vm3, %v462_v20 }
   0xb   :  { %p443_p3 = por %p442_p2, %p441_p1 }
   0xd   :  { %p444_p4 = pnand %p443_p3, %p437_p0 }
  0xd8   :  { %v369_v6 = vpop.f32.mrb[0].mxu0 }
  0xd9   :  { %416 = vtanh.f32 %v369_v6  ;;  %v106_v7 = vpop.f32.mrb[1].mxu0 }
  0xda   :  { %418 = vtanh.f32 %v106_v7 }
  0xdc   :  { %v372_v8 = vpop.f32.mrb[2].mxu0 }
  0xdd   :  { %420 = vtanh.f32 %v372_v8  ;;  %v116_v9 = vpop.f32.mrb[3].mxu0 }
  0xde   :  { %422 = vtanh.f32 %v116_v9 }
  0xe3   :  { %v417_v10 = vpop.eup %416 }
  0xe4   :  { %v419_v11 = vpop.eup %418 }
  0xe5   :  { %v398_v12 = vpack.c.bf16 %v417_v10, %v419_v11 }
  0xe7   :  { %v421_v13 = vpop.eup %420  ;;  %399 = vmatprep.subr.bf16.mxu1 %v398_v12 }
  0xe8   :  { %v423_v14 = vpop.eup %422  ;;  %401 = vmatpush3.bf16.msra.mxu1 %v398_v12 }
  0xe9   :  { %v402_v15 = vpack.c.bf16 %v421_v13, %v423_v14 }
  0xeb   :  { %403 = vmatprep.subr.bf16.mxu1 %v402_v15 }
  0xec   :  { %405 = vmatpush3.bf16.msra.mxu1 %v402_v15 }
  0xef   :  { %382 = vmatmul.mubr.msk.f32.vlgmr.msra.gmra.mrb[0].mxu1 %vm133_vm2, %v130_v16 }
  0xf0   :  { %384 = vmatprep.mubr.msk.f32.mxu1 %vm133_vm2, %v131_v17 }
  0xf3   :  { %385 = vmatmul.mubr.msk.f32.gmra.mrb[2].mxu1 %vm133_vm2, %v132_v18 }
 0x1c2   :  { %v383_v21 = vpop.f32.mrb[0].mxu1 }
 0x1c3   :  { %424 = vtanh.f32 %v383_v21  ;;  %v212_v22 = vpop.f32.mrb[1].mxu1 }
 0x1c4   :  { %426 = vtanh.f32 %v212_v22 }
 0x1c6   :  { %v386_v23 = vpop.f32.mrb[2].mxu1 }
 0x1c7   :  { %428 = vtanh.f32 %v386_v23  ;;  %v222_v24 = vpop.f32.mrb[3].mxu1 }
 0x1c8   :  { %430 = vtanh.f32 %v222_v24 }
 0x1cd   :  { %v425_v25 = vpop.eup %424 }
 0x1ce   :  { %v427_v26 = vpop.eup %426 }
 0x1cf   :  { %v407_v27 = vpack.c.bf16 %v425_v25, %v427_v26 }
 0x1d1   :  { %v429_v28 = vpop.eup %428  ;;  %408 = vmatpush3.bf16.msra.mxu0 %v407_v27 }
 0x1d2   :  { %v431_v29 = vpop.eup %430  ;;  %409 = vmatprep.subr.bf16.mxu0 %v460_v19 }
 0x1d3   :  { %v410_v30 = vpack.c.bf16 %v429_v28, %v431_v29 }
 0x1d5   :  { %411 = vmatpush3.bf16.msra.mxu0 %v410_v30 }
 0x1d8   :  { %396 = vmatmul.mubr.msk.f32.vlgmr.msra.gmra.mrb[4].mxu0 %vm133_vm2, %v235_v31 }
 0x2ab   :  { %v305_v32 = vpop.f32.mrb[4].mxu0 }
 0x2ac   :  { %v310_v33 = vrot.slane %v305_v32, 7  ;;  %v397_v34 = vpop.f32.mrb[5].mxu0 }
 0x2ae   :  { %v312_v35 = vsub.f32 %v305_v32, %v310_v33 }
 0x2b0   :  { %v313_v36 = vsub.f32 0.0, %v312_v35 }
 0x2b2   :  { %v314_v37 = vmul.f32 1.442695, %v313_v36 }
 0x2b4   :  { %432 = vpow2.f32 %v314_v37 }
 0x2be   :  { %v433_v38 = vpop.eup %432 }
 0x2bf   :  { %v316_v39 = vadd.f32 1.0, %v433_v38 }
 0x2c1   :  { %434 = vrcp.f32 %v316_v39 }
 0x2cb   :  { %v435_v40 = vpop.eup %434 }
 0x2cc   :  { %v319_v41 = vsub.f32 1.0, %v435_v40  ;;  %322 = vst.msk [vmem:[#allocation2] sm:$0x2] %vm320_vm4, %v435_v40 }
 0x2ce   :  { %321 = vst.msk [vmem:[#allocation2 - $0x1] sm:$0x2] %vm320_vm4, %v319_v41 }
 0x2cf   :  { %447 = shalt.err (!%p444_p4)
}
 0x2d0   :  { %s448_s10 = scalar_lea.hbm %s540_s4, 32 }
 0x2d1   :  { %p449_p5 = scmp.ne.s32.totalorder %s540_s4, %s448_s10  ;;  %p452_p6 = scmp.lt.u32.totalorder %s448_s10, %s540_s4 }
 0x2d3   :  { %p454_p7 = pnand %p452_p6, %p449_p5 }
 0x2d5   :  { %457 = shalt.err (!%p454_p7)
}
 0x2d6   :  { %332 = dma.vmem_to_hbm [thread:$0]  %s330_s7, 32, %s540_s4, [#allocation3]  }
 0x2d7   :  { %458 = dma.done.wait [#allocation3], 32  }
 0x2d8   :  { %459 = vsyncadd [#allocation3], 4294967264 }
 0x2d9   :  { %336 = vsyncpa [#allocation3], 1 }

</bundles_post_ra>
